<compile_context>
chip_gen: v7x
topology: tpu7x:2x2x1
jax: 0.10.0
libtpu: 0.0.40
codegen_flags: <defaults>
</compile_context>

<pallas_src>
import functools

import jax
import jax.numpy as jnp
from jax.experimental import pallas as pl
from jax.experimental.pallas import tpu as pltpu

EPS = 1e-5                      # torch BatchNorm1d default eps
LANE = 128                      # TPU lane width: all feature dims padded to this
MXU_DTYPE = jnp.bfloat16        # matmul operand dtype (accumulation stays f32)
ACT_DTYPE = jnp.bfloat16        # storage dtype of inter-kernel activations
ROW_ALIGN = 16                  # bf16 sublane packing -> row tiles multiple of 16
TA_MAX = 512                    # max atoms per row tile (edge tiles are TA*nnn rows)
VMEM_LIMIT = 32 * 1024 * 1024   # explicit scoped-VMEM budget (safe on v5e/v6e/v7x)


# ---------------------------- small helpers ----------------------------

def _round_up(n, m):
    return ((n + m - 1) // m) * m


def _pad_axis(x, axis, size):
    if x.shape[axis] == size:
        return x
    widths = [(0, 0)] * x.ndim
    widths[axis] = (0, size - x.shape[axis])
    return jnp.pad(x, widths)


def _row_tiling(n_rows):
    """Pick an atom-row tile: >=2 grid steps when possible (both v7x TCs busy),
    rows rounded to 16 for bf16 sublane packing, capped at TA_MAX."""
    if n_rows <= ROW_ALIGN:
        ta = ROW_ALIGN
    else:
        ta = min(TA_MAX, _round_up(-(-n_rows // 2), ROW_ALIGN))
    return ta, _round_up(n_rows, ta)


def _compiler_params():
    return pltpu.CompilerParams(dimension_semantics=("parallel",),
                                vmem_limit_bytes=VMEM_LIMIT)


def _softplus(x):
    # one exp + one log (vs. two of each for the where() form); matches F.softplus
    return jnp.maximum(x, 0.0) + jnp.log(1.0 + jnp.exp(-jnp.abs(x)))


def _partial_stats(y, tm, m_real):
    """Masked per-tile column sum / sum-of-squares, each shaped (1, 1, F)."""
    row = pl.program_id(0) * tm + jax.lax.broadcasted_iota(jnp.int32, (tm, 1), 0)
    ym = jnp.where(row < m_real, y, 0.0)
    s = jnp.sum(ym, axis=0, keepdims=True)[None]
    ss = jnp.sum(ym * ym, axis=0, keepdims=True)[None]
    return s, ss


def _finalize_stats(s, ss, m_real):
    tot = jnp.sum(s, axis=(0, 1))
    tot2 = jnp.sum(ss, axis=(0, 1))
    mean = tot / m_real
    var = jnp.maximum(tot2 / m_real - mean * mean, 0.0)   # biased var (torch fwd)
    return mean, var


def _bn_scale_shift(mean, var, gamma, beta):
    scale = gamma * jax.lax.rsqrt(var + EPS)
    shift = beta - mean * scale
    return scale, shift


# ---------------------------- Pallas kernels ----------------------------

def _stats_kernel(x_ref, s_ref, ss_ref, *, tm, m_real):
    s, ss = _partial_stats(x_ref[...].astype(jnp.float32), tm, m_real)
    s_ref[...] = s
    ss_ref[...] = ss


def _linear_kernel(x_ref, w_ref, b_ref, o_ref, *, act):
    # w_ref is already bf16 (pre-cast outside); x may be f32 (raw inputs) or bf16.
    y = jnp.dot(x_ref[...].astype(MXU_DTYPE), w_ref[...],
                preferred_element_type=jnp.float32) + b_ref[...]
    if act:
        y = _softplus(y)
    o_ref[...] = y.astype(o_ref.dtype)


def _bond_update_kernel(x_ref, e_ref, w_ref, y_ref, s_ref, ss_ref, *, tm, m_real):
    # Fused per-edge update: matmul + per-edge additive term + softplus + the
    # BatchNorm batch-statistics, in a single pass over the edge tile.
    y = (jnp.dot(x_ref[...], w_ref[...], preferred_element_type=jnp.float32)
         + e_ref[...].astype(jnp.float32))
    y = _softplus(y)
    y_ref[...] = y.astype(y_ref.dtype)
    s, ss = _partial_stats(y, tm, m_real)
    s_ref[...] = s
    ss_ref[...] = ss


def _atom_update_kernel(x1_ref, x2_ref, w1_ref, w2_ref, b_ref, y_ref, s_ref, ss_ref,
                        *, act, nnn, fb, tm, m_real):
    # In-kernel neighbour sum over the nnn lane-aligned 128-wide slabs (f32 VPU
    # adds), then ONE (tm, fb) @ (fb, F) matmul -- no nnn-times tiled weight.
    x1 = x1_ref[...]
    bsum = x1[:, :fb].astype(jnp.float32)
    for k in range(1, nnn):
        bsum = bsum + x1[:, k * fb:(k + 1) * fb].astype(jnp.float32)
    y = (jnp.dot(bsum.astype(MXU_DTYPE), w1_ref[...], preferred_element_type=jnp.float32)
         + jnp.dot(x2_ref[...], w2_ref[...], preferred_element_type=jnp.float32)
         + b_ref[...])
    if act:
        y = _softplus(y)
    y_ref[...] = y.astype(y_ref.dtype)
    s, ss = _partial_stats(y, tm, m_real)
    s_ref[...] = s
    ss_ref[...] = ss


# ---------------------------- pallas_call wrappers ----------------------------

def batch_stats(x, m_real, tm):
    """Column mean / biased variance over the first m_real rows of x."""
    M, F = x.shape
    g = M // tm
    s, ss = pl.pallas_call(
        functools.partial(_stats_kernel, tm=tm, m_real=m_real),
        out_shape=(jax.ShapeDtypeStruct((g, 1, F), jnp.float32),
                   jax.ShapeDtypeStruct((g, 1, F), jnp.float32)),
        grid=(g,),
        in_specs=[pl.BlockSpec((tm, F), lambda i: (i, 0))],
        out_specs=(pl.BlockSpec((1, 1, F), lambda i: (i, 0, 0)),
                   pl.BlockSpec((1, 1, F), lambda i: (i, 0, 0))),
        compiler_params=_compiler_params(),
    )(x)
    return _finalize_stats(s, ss, m_real)


def linear(x, w, b, *, act, tm, out_dtype=ACT_DTYPE):
    """(softplus of) x @ w + b, row-tiled; output stored in out_dtype (bf16)."""
    M, K = x.shape
    F = w.shape[1]
    g = M // tm
    return pl.pallas_call(
        functools.partial(_linear_kernel, act=act),
        out_shape=jax.ShapeDtypeStruct((M, F), out_dtype),
        grid=(g,),
        in_specs=[pl.BlockSpec((tm, K), lambda i: (i, 0)),
                  pl.BlockSpec((K, F), lambda i: (0, 0)),
                  pl.BlockSpec((1, F), lambda i: (0, 0))],
        out_specs=pl.BlockSpec((tm, F), lambda i: (i, 0)),
        compiler_params=_compiler_params(),
    )(x, w.astype(MXU_DTYPE), b)


def bond_update(x, ebias, w, *, tm, m_real):
    M, K = x.shape
    F = w.shape[1]
    g = M // tm
    return pl.pallas_call(
        functools.partial(_bond_update_kernel, tm=tm, m_real=m_real),
        out_shape=(jax.ShapeDtypeStruct((M, F), ACT_DTYPE),
                   jax.ShapeDtypeStruct((g, 1, F), jnp.float32),
                   jax.ShapeDtypeStruct((g, 1, F), jnp.float32)),
        grid=(g,),
        in_specs=[pl.BlockSpec((tm, K), lambda i: (i, 0)),
                  pl.BlockSpec((tm, F), lambda i: (i, 0)),
                  pl.BlockSpec((K, F), lambda i: (0, 0))],
        out_specs=(pl.BlockSpec((tm, F), lambda i: (i, 0)),
                   pl.BlockSpec((1, 1, F), lambda i: (i, 0, 0)),
                   pl.BlockSpec((1, 1, F), lambda i: (i, 0, 0))),
        compiler_params=_compiler_params(),
    )(x, ebias, w.astype(MXU_DTYPE))


def atom_update(x1, x2, w1, w2, b, *, act, nnn, tm, m_real, out_dtype=ACT_DTYPE):
    """y = [softplus]( sum_k(x1 slab k) @ w1 + x2 @ w2 + b ) + BN partial stats."""
    M, K1 = x1.shape
    K2 = x2.shape[1]
    fb = K1 // nnn
    F = w1.shape[1]
    g = M // tm
    return pl.pallas_call(
        functools.partial(_atom_update_kernel, act=act, nnn=nnn, fb=fb,
                          tm=tm, m_real=m_real),
        out_shape=(jax.ShapeDtypeStruct((M, F), out_dtype),
                   jax.ShapeDtypeStruct((g, 1, F), jnp.float32),
                   jax.ShapeDtypeStruct((g, 1, F), jnp.float32)),
        grid=(g,),
        in_specs=[pl.BlockSpec((tm, K1), lambda i: (i, 0)),
                  pl.BlockSpec((tm, K2), lambda i: (i, 0)),
                  pl.BlockSpec((fb, F), lambda i: (0, 0)),
                  pl.BlockSpec((K2, F), lambda i: (0, 0)),
                  pl.BlockSpec((1, F), lambda i: (0, 0))],
        out_specs=(pl.BlockSpec((tm, F), lambda i: (i, 0)),
                   pl.BlockSpec((1, 1, F), lambda i: (i, 0, 0)),
                   pl.BlockSpec((1, 1, F), lambda i: (i, 0, 0))),
        compiler_params=_compiler_params(),
    )(x1, x2, w1.astype(MXU_DTYPE), w2.astype(MXU_DTYPE), b)


# ---------------------------- parameter init (padded/split) ----------------------------

def init_gcnn(key, n_atom_feature, n_bond_feature, nnn,
              a_embeded=20, b_embeded=30, nconv=3):
    FA = _round_up(n_atom_feature, LANE)
    FB = _round_up(n_bond_feature, LANE)
    A = _round_up(a_embeded, LANE)
    B = _round_up(b_embeded, LANE)

    def lin(k, fan_in, fan_out):
        # torch.nn.Linear default init: U(-1/sqrt(fan_in), 1/sqrt(fan_in)), real fan_in
        k1, k2 = jax.random.split(k)
        bound = 1.0 / float(fan_in) ** 0.5
        w = jax.random.uniform(k1, (fan_in, fan_out), jnp.float32, -bound, bound)
        b = jax.random.uniform(k2, (fan_out,), jnp.float32, -bound, bound)
        return w, b

    def pad_mat(w, rows, cols):
        return jnp.zeros((rows, cols), jnp.float32).at[:w.shape[0], :w.shape[1]].set(w)

    def pad_row(v, n):
        return jnp.zeros((1, n), jnp.float32).at[0, :v.shape[-1]].set(jnp.reshape(v, (-1,)))

    keys = jax.random.split(key, 3 + nconv)
    params = {"cfg": dict(nnn=nnn, FA=FA, FB=FB, A=A, B=B)}

    params["bn1"] = (pad_row(jnp.ones((n_bond_feature,), jnp.float32), FB),
                     pad_row(jnp.zeros((n_bond_feature,), jnp.float32), FB))

    w, b = lin(keys[0], n_bond_feature, b_embeded)
    params["bond_embed"] = (pad_mat(w, FB, B), pad_row(b, B))
    w, b = lin(keys[1], n_atom_feature, a_embeded)
    params["atom_embed"] = (pad_mat(w, FA, A), pad_row(b, A))

    # fc acts on [mean_nnn(bond) | atom]  -> split along fan-in, pad out-dim to a lane
    w, b = lin(keys[2], a_embeded + b_embeded, 1)
    params["fc"] = (pad_mat(w[:b_embeded], B, LANE),
                    pad_mat(w[b_embeded:], A, LANE),
                    pad_row(b, LANE))

    convs = []
    for i in range(nconv):
        kb, ka = jax.random.split(keys[3 + i])
        wb, bb = lin(kb, 2 * a_embeded + b_embeded, b_embeded)     # [self | nbr | bond]
        wa, ba = lin(ka, b_embeded + a_embeded, a_embeded)         # [bsum | atom]
        convs.append({
            "w_self": pad_mat(wb[:a_embeded], A, B),
            "w_nbr": pad_mat(wb[a_embeded:2 * a_embeded], A, B),
            "w_bond": pad_mat(wb[2 * a_embeded:], B, B),
            "bb": pad_row(bb, B),
            "w_asum": pad_mat(wa[:b_embeded], B, A),
            "w_aatom": pad_mat(wa[b_embeded:], A, A),
            "ba": pad_row(ba, A),
            "gamma1": pad_row(jnp.ones((b_embeded,), jnp.float32), B),
            "beta1": pad_row(jnp.zeros((b_embeded,), jnp.float32), B),
            "gamma2": pad_row(jnp.ones((a_embeded,), jnp.float32), A),
            "beta2": pad_row(jnp.zeros((a_embeded,), jnp.float32), A),
        })
    params["convs"] = convs
    return params


# ---------------------------- forward pass ----------------------------

def gcnn_forward(params, gmap, atom, bonds, crystal_id, *, site=False):
    cfg = params["cfg"]
    nnn = cfg["nnn"]
    FA, FB, A, B = cfg["FA"], cfg["FB"], cfg["A"], cfg["B"]
    N = atom.shape[0]
    E = N * nnn

    # ---- row tiling / padding (feature axes -> 128 lanes, rows -> tile multiple) ----
    TA, Np = _row_tiling(N)
    TE = TA * nnn
    Ep = Np * nnn

    atom_p = _pad_axis(_pad_axis(atom.astype(jnp.float32), 1, FA), 0, Np)     # (Np, FA)
    bonds_p = _pad_axis(_pad_axis(bonds.astype(jnp.float32), 2, FB), 0, Np)   # (Np,nnn,FB)
    bonds2 = bonds_p.reshape(Ep, FB)
    gmap_p = _pad_axis(gmap.astype(jnp.int32), 0, Np)                         # (Np, nnn)

    # ---- model-level bn1 folded into the bond embedding matmul (training stats) ----
    mean1, var1 = batch_stats(bonds2, E, TE)
    s1, t1 = _bn_scale_shift(mean1, var1, params["bn1"][0][0], params["bn1"][1][0])
    w_be, b_be = params["bond_embed"]
    bond_val = linear(bonds2, s1[:, None] * w_be, b_be + t1[None, :] @ w_be,
                      act=True, tm=TE)                                        # (Ep, B) bf16
    sb = jnp.ones((B,), jnp.float32)    # lazy-BN scale/shift carried with bond_val
    tb = jnp.zeros((B,), jnp.float32)

    # ---- atom embedding ----
    w_ae, b_ae = params["atom_embed"]
    atom_val = linear(atom_p, w_ae, b_ae, act=True, tm=TA)                    # (Np, A) bf16
    sa = jnp.ones((A,), jnp.float32)    # lazy-BN scale/shift carried with atom_val
    ta_sh = jnp.zeros((A,), jnp.float32)

    # ---- graph convolutions ----
    for p in params["convs"]:
        # b_update weight split: [W_self | W_nbr | W_bond]; self/nbr projections are
        # computed once per atom (not per edge) with the carried BN affine folded in.
        w_proj = jnp.concatenate([sa[:, None] * p["w_self"],
                                  sa[:, None] * p["w_nbr"]], axis=1)          # (A, 2B)
        const = (p["bb"] + ta_sh[None, :] @ (p["w_self"] + p["w_nbr"])
                 + tb[None, :] @ p["w_bond"])                                 # (1, B)
        b_proj = jnp.concatenate([const, jnp.zeros((1, B), jnp.float32)], axis=1)
        proj = linear(atom_val, w_proj, b_proj, act=False, tm=TA)             # (Np,2B) bf16

        # per-edge additive term (bf16 -> half the HBM traffic of the old f32 one).
        # TODO(synk): do this gather inside _bond_update_kernel (proj resident in
        # VMEM + gmap in SMEM) to drop the (Ep, B) intermediate entirely.
        ebias = (proj[:, None, :B]
                 + jnp.take(proj[:, B:], gmap_p, axis=0)).reshape(Ep, B)

        # fused edge update: matmul + softplus + BN batch statistics in one pass
        bond_val, s_b, ss_b = bond_update(bond_val, ebias,
                                          sb[:, None] * p["w_bond"],
                                          tm=TE, m_real=E)
        mean_b, var_b = _finalize_stats(s_b, ss_b, E)
        sb, tb = _bn_scale_shift(mean_b, var_b, p["gamma1"][0], p["beta1"][0])

        # fused atom update: neighbour sum done in-kernel over the nnn lane slabs of
        # the free (Np, nnn*B) view of the edge tensor; BN affines folded exactly.
        w1 = sb[:, None] * p["w_asum"]                                        # (B, A)
        w2 = sa[:, None] * p["w_aatom"]                                       # (A, A)
        b_a = (p["ba"] + nnn * (tb[None, :] @ p["w_asum"])
               + ta_sh[None, :] @ p["w_aatom"])
        atom_val, s_a, ss_a = atom_update(bond_val.reshape(Np, nnn * B), atom_val,
                                          w1, w2, b_a, act=True, nnn=nnn,
                                          tm=TA, m_real=N)
        mean_a, var_a = _finalize_stats(s_a, ss_a, N)
        sa, ta_sh = _bn_scale_shift(mean_a, var_a, p["gamma2"][0], p["beta2"][0])

    # ---- readout: fc([mean_nnn(bond_bn) | atom_bn]) with BN affines + the 1/nnn folded in
    wf_b, wf_a, bf = params["fc"]
    w1 = (sb / nnn)[:, None] * wf_b
    w2 = sa[:, None] * wf_a
    b_fc = bf + tb[None, :] @ wf_b + ta_sh[None, :] @ wf_a
    y_atom, _, _ = atom_update(bond_val.reshape(Np, nnn * B), atom_val,
                               w1, w2, b_fc, act=False, nnn=nnn,
                               tm=TA, m_real=N, out_dtype=jnp.float32)
    y_atom = y_atom[:N, :1]                                                   # (N, 1)

    if site:
        return y_atom

    # per-crystal mean pooling (fc is affine, so fc(mean(x)) == mean(fc(x)) exactly)
    idx = jnp.concatenate([jnp.asarray(ci, jnp.int32) for ci in crystal_id])
    seg = jnp.concatenate([jnp.full((len(ci),), k, jnp.int32)
                           for k, ci in enumerate(crystal_id)])
    counts = jnp.asarray([len(ci) for ci in crystal_id], jnp.float32)[:, None]
    pooled = jax.ops.segment_sum(y_atom[idx], seg,
                                 num_segments=len(crystal_id)) / counts
    return pooled


# ---------------------------- demo ----------------------------

if __name__ == "__main__":
    key = jax.random.PRNGKey(0)
    N, nnn = 16, 4
    n_atom_feature, n_bond_feature = 8, 6
    a_embeded, b_embeded, nconv = 20, 30, 3

    k1, k2, k3, kp = jax.random.split(key, 4)
    atom = jax.random.normal(k1, (N, n_atom_feature), jnp.float32)
    bonds = jax.random.normal(k2, (N, nnn, n_bond_feature), jnp.float32)
    gmap = jax.random.randint(k3, (N, nnn), 0, N)                 # neighbour indices
    crystal_id = [jnp.arange(0, 8), jnp.arange(8, 16)]            # 2 crystals of 8 atoms

    params = init_gcnn(kp, n_atom_feature, n_bond_feature, nnn,
                       a_embeded, b_embeded, nconv)

    y = gcnn_forward(params, gmap, atom, bonds, crystal_id, site=False)
    y = jax.block_until_ready(y)
    assert y.shape == (len(crystal_id), 1)
    print("KERNEL_OK")
</pallas_src>

<mosaic_0001>
module attributes {stable_mosaic.version = 11 : i64} {
  func.func @_stats_kernel(%arg0: i32, %arg1: memref<64x128xf32, #tpu.memory_space<vmem>>, %arg2: memref<1x1x128xf32, #tpu.memory_space<vmem>>, %arg3: memref<1x1x128xf32, #tpu.memory_space<vmem>>) attributes {dimension_semantics = [#tpu.dimension_semantics<parallel>], iteration_bounds = array<i64: 1>, scalar_prefetch = 0 : i64, scratch_operands = 0 : i64, tpu.core_type = #tpu.core_type<tc>, window_params = [{transform_indices = @transform_0, window_bounds = array<i64: 64, 128>}, {transform_indices = @transform_1, window_bounds = array<i64: 1, 1, 128>}, {transform_indices = @transform_2, window_bounds = array<i64: 1, 1, 128>}]} {
    %c0 = arith.constant 0 : index
    %c0_0 = arith.constant 0 : index
    %0 = vector.load %arg1[%c0, %c0_0] : memref<64x128xf32, #tpu.memory_space<vmem>>, vector<64x128xf32>
    %c64_i32 = arith.constant 64 : i32
    %1 = arith.muli %arg0, %c64_i32 : i32
    %2 = tpu.iota {dimensions = array<i32: 0>} : vector<64x1xi32>
    %3 = vector.broadcast %1 : i32 to vector<64x1xi32>
    %4 = arith.addi %3, %2 : vector<64x1xi32>
    %c64_i32_1 = arith.constant 64 : i32
    %5 = vector.broadcast %c64_i32_1 : i32 to vector<64x1xi32>
    %6 = arith.cmpi slt, %4, %5 : vector<64x1xi32>
    %cst = arith.constant 0.000000e+00 : f32
    %7 = vector.shape_cast %6 : vector<64x1xi1> to vector<64x1xi1>
    %8 = vector.broadcast %7 : vector<64x1xi1> to vector<64x128xi1>
    %9 = vector.broadcast %cst : f32 to vector<64x128xf32>
    %10 = arith.select %8, %0, %9 : vector<64x128xi1>, vector<64x128xf32>
    %cst_2 = arith.constant dense<0.000000e+00> : vector<128xf32>
    %11 = vector.multi_reduction <add>, %10, %cst_2 [0] : vector<64x128xf32> to vector<128xf32>
    %12 = vector.shape_cast %11 : vector<128xf32> to vector<1x128xf32>
    %13 = vector.shape_cast %12 : vector<1x128xf32> to vector<1x1x128xf32>
    %14 = arith.mulf %10, %10 : vector<64x128xf32>
    %cst_3 = arith.constant dense<0.000000e+00> : vector<128xf32>
    %15 = vector.multi_reduction <add>, %14, %cst_3 [0] : vector<64x128xf32> to vector<128xf32>
    %16 = vector.shape_cast %15 : vector<128xf32> to vector<1x128xf32>
    %17 = vector.shape_cast %16 : vector<1x128xf32> to vector<1x1x128xf32>
    %c0_4 = arith.constant 0 : index
    %c0_5 = arith.constant 0 : index
    %c0_6 = arith.constant 0 : index
    %18 = vector.load %arg2[%c0_4, %c0_5, %c0_6] : memref<1x1x128xf32, #tpu.memory_space<vmem>>, vector<1x1x128xf32>
    tpu.vector_store %arg2[%c0_4, %c0_5, %c0_6], %13 {strides = array<i32>} : memref<1x1x128xf32, #tpu.memory_space<vmem>>, vector<1x1x128xf32>,
    %c0_7 = arith.constant 0 : index
    %c0_8 = arith.constant 0 : index
    %c0_9 = arith.constant 0 : index
    %19 = vector.load %arg3[%c0_7, %c0_8, %c0_9] : memref<1x1x128xf32, #tpu.memory_space<vmem>>, vector<1x1x128xf32>
    tpu.vector_store %arg3[%c0_7, %c0_8, %c0_9], %17 {strides = array<i32>} : memref<1x1x128xf32, #tpu.memory_space<vmem>>, vector<1x1x128xf32>,
    return
  }
  func.func @transform_0(%arg0: i32) -> (i32, i32) {
    %c0_i32 = arith.constant 0 : i32
    %c0_i32_0 = arith.constant 0 : i32
    return %arg0, %c0_i32 : i32, i32
  }
  func.func @transform_1(%arg0: i32) -> (i32, i32, i32) {
    %c0_i32 = arith.constant 0 : i32
    %c0_i32_0 = arith.constant 0 : i32
    %c0_i32_1 = arith.constant 0 : i32
    return %arg0, %c0_i32, %c0_i32_0 : i32, i32, i32
  }
  func.func @transform_2(%arg0: i32) -> (i32, i32, i32) {
    %c0_i32 = arith.constant 0 : i32
    %c0_i32_0 = arith.constant 0 : i32
    %c0_i32_1 = arith.constant 0 : i32
    return %arg0, %c0_i32, %c0_i32_0 : i32, i32, i32
  }
}

</mosaic_0001>

<bundles_post_ra>
// kernel: tpu_custom_call.1
= control target key start
LH: loop header
LB: loop body
LE: loop exit
PB: predicated region body
PF: predicated region fallthrough
CT: control target
= control target key end

     0   :  { %8 = vsyncpa [#allocation3], 0  ;;  %s291_s0 = inlined_call_operand.hbm [shape: f32[64,128], index: 0, kind: input, shape index: {}]   ;;  %s292_s1 = inlined_call_operand.hbm [shape: f32[1,1,128], index: 1, kind: output, shape index: {0}]   ;;  %s293_s2 = inlined_call_operand.hbm [shape: f32[1,1,128], index: 2, kind: output, shape index: {1}]  }
   0x1   :  { %9 = vsyncpa [#allocation4], 0 }
   0x2   :  { %10 = vsyncpa [#allocation7], 0  ;;  %s227_s9 = smov [#allocation2]   ;;  %s155_s13 = scalar_lea.hbm %s291_s0, 1024 }
   0x3   :  { %s16_s10 = sshll.u32 %s227_s9, 4  ;;  %p156_p0 = scmp.ne.s32.totalorder %s291_s0, %s155_s13  ;;  %s17_s10 = int_to_ptr.vmem [resolvable:$true] %s16_s10 }
   0x4   :  { %p159_p1 = scmp.lt.u32.totalorder %s155_s13, %s291_s0 }
   0x6   :  { %p161_p2 = pnand %p159_p1, %p156_p0 }
   0x8   :  { %164 = shalt.err (!%p161_p2)
}
   0x9   :  { %s165_s18 = scalar_lea.vmem %s17_s10, 1024  ;;  %p170_p4 = scmp.lt.s32.totalorder %s17_s10, %s17_s10 }
   0xa   :  { %p166_p3 = scmp.ne.s32.totalorder %s17_s10, %s165_s18  ;;  %p171_p5 = scmp.lt.s32.totalorder %s165_s18, %s165_s18 }
   0xc   :  { %p172_p6 = por %p171_p5, %p170_p4 }
   0xe   :  { %p173_p7 = pnand %p172_p6, %p166_p3 }
  0x10   :  { %176 = shalt.err (!%p173_p7)
}
  0x11   :  { %s228_s19 = smov 128   ;;  %s229_s20 = smov 8  }
  0x12   :  { %22 = dma.hbm_to_vmem [thread:$0]  %s291_s0, 1024, %s17_s10, [#allocation3], %s228_s19, %s228_s19, %s229_s20  }
  0x13   :  { %221 = dma.done.wait [#allocation3], 1024  }
  0x14   :  { %222 = vsyncadd [#allocation3], 4294966272  ;;  %v26_v0 = vld [vmem:[#allocation2] sm:$0xff]  ;;  %v27_v1 = vld [vmem:[#allocation2 + $0x8] sm:$0xff]  ;;  %s230_s0 = smov [#allocation5]   ;;  %s231_s24 = smov [#allocation6]  }
  0x15   :  { %v28_v2 = vld [vmem:[#allocation2 + $0x10] sm:$0xff]  ;;  %v29_v3 = vld [vmem:[#allocation2 + $0x18] sm:$0xff]  ;;  %v85_v4 = vadd.f32 %v27_v1, %v26_v0  ;;  %v98_v5 = vmul.f32 %v26_v0, %v26_v0  ;;  %v99_v6 = vmul.f32 %v27_v1, %v27_v1  ;;  %v30_v8 = vld [vmem:[#allocation2 + $0x20] sm:$0xff]  ;;  %s127_s23 = sshll.u32 %s230_s0, 4  ;;  %s137_s25 = sshll.u32 %s231_s24, 4  ;;  %s128_s23 = int_to_ptr.vmem [resolvable:$true] %s127_s23  ;;  %s259_s25 = int_to_ptr.vmem [resolvable:$true] %s137_s25 }
  0x16   :  { %v100_v7 = vmul.f32 %v28_v2, %v28_v2  ;;  %v101_v10 = vmul.f32 %v29_v3, %v29_v3  ;;  %v31_v12 = vld [vmem:[#allocation2 + $0x28] sm:$0xff]  ;;  %v102_v14 = vmul.f32 %v30_v8, %v30_v8  ;;  %v32_v16 = vld [vmem:[#allocation2 + $0x30] sm:$0xff]  ;;  %v33_v20 = vld [vmem:[#allocation2 + $0x38] sm:$0xff]  ;;  %s177_s26 = scalar_lea.vmem %s128_s23, 16  ;;  %s181_s27 = scalar_lea.vmem %s128_s23, 32 }
  0x17   :  { %v86_v9 = vadd.f32 %v85_v4, %v28_v2  ;;  %v106_v11 = vadd.f32 %v99_v6, %v98_v5  ;;  %v103_v18 = vmul.f32 %v31_v12, %v31_v12  ;;  %v104_v22 = vmul.f32 %v32_v16, %v32_v16  ;;  %p178_p8 = scmp.ne.s32.totalorder %s128_s23, %s177_s26  ;;  %p182_p9 = scmp.lt.s32.totalorder %s128_s23, %s128_s23 }
  0x18   :  { %v105_v25 = vmul.f32 %v33_v20, %v33_v20  ;;  %p183_p10 = scmp.lt.s32.totalorder %s181_s27, %s177_s26 }
  0x19   :  { %v87_v13 = vadd.f32 %v86_v9, %v29_v3  ;;  %v107_v15 = vadd.f32 %v106_v11, %v100_v7 }
  0x1a   :  { %p184_p11 = por %p183_p10, %p182_p9 }
  0x1b   :  { %v88_v17 = vadd.f32 %v87_v13, %v30_v8  ;;  %v108_v19 = vadd.f32 %v107_v15, %v101_v10 }
  0x1c   :  { %p185_p12 = pnand %p184_p11, %p178_p8 }
  0x1d   :  { %v89_v21 = vadd.f32 %v88_v17, %v31_v12  ;;  %v109_v23 = vadd.f32 %v108_v19, %v102_v14 }
  0x1f   :  { %v90_v24 = vadd.f32 %v89_v21, %v32_v16  ;;  %v110_v26 = vadd.f32 %v109_v23, %v103_v18 }
  0x21   :  { %v91_v27 = vadd.f32 %v90_v24, %v33_v20  ;;  %v111_v28 = vadd.f32 %v110_v26, %v104_v22 }
  0x23   :  { %v92_v29 = vrot.slane %v91_v27, 4  ;;  %v112_v30 = vadd.f32 %v111_v28, %v105_v25 }
  0x25   :  { %v93_v31 = vadd.f32 %v92_v29, %v91_v27  ;;  %v113_v32 = vrot.slane %v112_v30, 4 }
  0x27   :  { %v94_v33 = vrot.slane %v93_v31, 2  ;;  %v114_v34 = vadd.f32 %v113_v32, %v112_v30 }
  0x29   :  { %v95_v35 = vadd.f32 %v94_v33, %v93_v31  ;;  %v115_v36 = vrot.slane %v114_v34, 2 }
  0x2b   :  { %v96_v37 = vrot.slane %v95_v35, 1  ;;  %v116_v38 = vadd.f32 %v115_v36, %v114_v34 }
  0x2d   :  { %v97_v39 = vadd.f32 %v96_v37, %v95_v35  ;;  %v117_v40 = vrot.slane %v116_v38, 1 }
  0x2f   :  { %119 = vst [vmem:[#allocation5] sm:$0x1] %v97_v39  ;;  %v118_v41 = vadd.f32 %v117_v40, %v116_v38 }
  0x30   :  { %188 = shalt.err (!%p185_p12)
}
  0x31   :  { %s189_s30 = scalar_lea.hbm %s292_s1, 16 }
  0x32   :  { %p190_p13 = scmp.ne.s32.totalorder %s292_s1, %s189_s30  ;;  %p193_p0 = scmp.lt.u32.totalorder %s189_s30, %s292_s1 }
  0x34   :  { %p195_p1 = pnand %p193_p0, %p190_p13 }
  0x36   :  { %198 = shalt.err (!%p195_p1)
}
  0x37   :  { %130 = dma.vmem_to_hbm [thread:$0]  %s128_s23, 16, %s292_s1, [#allocation4]   ;;  %120 = vst [vmem:[#allocation6] sm:$0x1] %v118_v41 }
  0x38   :  { %s199_s9 = scalar_lea.vmem %s259_s25, 16  ;;  %s203_s10 = scalar_lea.vmem %s259_s25, 32 }
  0x39   :  { %p200_p2 = scmp.ne.s32.totalorder %s259_s25, %s199_s9  ;;  %p204_p3 = scmp.lt.s32.totalorder %s259_s25, %s259_s25 }
  0x3a   :  { %p205_p4 = scmp.lt.s32.totalorder %s203_s10, %s199_s9 }
  0x3c   :  { %p206_p5 = por %p205_p4, %p204_p3 }
  0x3e   :  { %p207_p6 = pnand %p206_p5, %p200_p2 }
  0x40   :  { %210 = shalt.err (!%p207_p6)
}
  0x41   :  { %s211_s13 = scalar_lea.hbm %s293_s2, 16 }
  0x42   :  { %p212_p7 = scmp.ne.s32.totalorder %s293_s2, %s211_s13  ;;  %p215_p8 = scmp.lt.u32.totalorder %s211_s13, %s293_s2 }
  0x44   :  { %p217_p9 = pnand %p215_p8, %p212_p7 }
  0x46   :  { %220 = shalt.err (!%p217_p9)
}
  0x47   :  { %140 = dma.vmem_to_hbm [thread:$0]  %s259_s25, 16, %s293_s2, [#allocation7]  }
  0x48   :  { %223 = dma.done.wait [#allocation4], 16  }
  0x49   :  { %224 = vsyncadd [#allocation4], 4294967280 }
  0x4a   :  { %225 = dma.done.wait [#allocation7], 16  }
  0x4b   :  { %226 = vsyncadd [#allocation7], 4294967280 }
  0x4c   :  { %147 = vsyncpa [#allocation3], 1 }
  0x4d   :  { %148 = vsyncpa [#allocation4], 1 }
  0x4e   :  { %149 = vsyncpa [#allocation7], 1 }

</bundles_post_ra>
